<compile_context>
chip_gen: v6e
topology: v6e:2x2x1
jax: 0.10.0
libtpu: 0.0.40
codegen_flags: <defaults>
</compile_context>

<pallas_src>
import functools

import jax
import jax.numpy as jnp
from jax import lax
from jax.experimental import pallas as pl
from jax.experimental.pallas import tpu as pltpu

LEAKY_SLOPE = 0.2
CHN_MID = 32
FEAT_ROWS = 8   # 4 real feature rows (d0, d1, d0/(d1+eps), d1/(d0+eps)) + 4 zero rows


def _round_up(x: int, m: int) -> int:
    return (x + m - 1) // m * m


def _tile_cap_for_device():
    """Pick a pixel-tile cap + scoped-VMEM limit based on the TPU generation."""
    try:
        vmem_bytes = int(pltpu.get_tpu_info().vmem_capacity_bytes)
    except Exception:  # unknown chip / query unavailable -> conservative defaults
        return 16384, None
    if vmem_bytes > (64 << 20):   # v5e / v6e: 128 MiB VMEM, single TensorCore
        return 32768, 96 << 20
    return 16384, None            # v7x: 64 MiB per TensorCore, default scoped VMEM


def _recip(x):
    """EUP approximate reciprocal + one Newton step (~f32 accurate, off the VALU)."""
    r = pl.reciprocal(x, approx=True)
    return r * (2.0 - x * r)


def _bce_ranking_kernel(d0_ref, d1_ref, judge_ref,
                        w1_ref, b1_ref, w2_ref, b2_ref, w3t_ref, b3_ref,
                        partial_ref, feat_ref,
                        *, n_valid, eps, tile_p, needs_mask):
    i = pl.program_id(0)

    d0 = d0_ref[...]          # (1, TP) f32
    d1 = d1_ref[...]          # (1, TP) f32
    judge = judge_ref[...]    # (1, TP) f32

    # Ratio features on the EUP slot instead of the saturated VALU slot.
    r01 = d0 * _recip(d1 + eps)
    r10 = d1 * _recip(d0 + eps)

    # Assemble the (8, TP) feature block in VMEM scratch so the 5->32 layer
    # runs on the MXU.  (d0 - d1) is folded into the weights, so only 4 real
    # rows remain; rows 4..7 are zeroed every step (single block store) so
    # the zero-padded weight columns never multiply stale scratch contents.
    feat_ref[pl.ds(0, 1), :] = d0
    feat_ref[pl.ds(1, 1), :] = d1
    feat_ref[pl.ds(2, 1), :] = r01
    feat_ref[pl.ds(3, 1), :] = r10
    feat_ref[pl.ds(4, 4), :] = jnp.zeros((4, tile_p), jnp.float32)

    # --- Conv1x1 (5 -> 32) + LeakyReLU(0.2): MXU matmul with K = 8 ---
    h = jnp.dot(w1_ref[...], feat_ref[...],
                preferred_element_type=jnp.float32) + b1_ref[...]       # (32, TP)
    h = jnp.maximum(h, LEAKY_SLOPE * h)

    # --- Conv1x1 (32 -> 32) + LeakyReLU(0.2): MXU matmul ---
    h = jnp.dot(w2_ref[...], h,
                preferred_element_type=jnp.float32) + b2_ref[...]       # (32, TP)
    h = jnp.maximum(h, LEAKY_SLOPE * h)

    # --- Conv1x1 (32 -> 1): sublane reduction (XLU) ---
    z = jnp.sum(w3t_ref[...] * h, axis=0, keepdims=True) + b3_ref[...]  # (1, TP)

    # --- Sigmoid + BCE against per = (judge + 1)/2, stable log-sigmoid form ---
    # TODO(synk): PyTorch BCELoss clamps log terms at -100; the stable form here
    # is strictly more accurate and intentional.
    per = (judge + 1.0) * 0.5
    neg_abs = -jnp.abs(z)
    log_den = jnp.log1p(jnp.exp(neg_abs))          # log(1 + e^{-|z|})
    log_p = jnp.minimum(z, 0.0) - log_den          # log(sigmoid(z))
    log_1mp = jnp.minimum(-z, 0.0) - log_den       # log(1 - sigmoid(z))
    bce = -(per * log_p + (1.0 - per) * log_1mp)   # (1, TP)

    if needs_mask:
        last = pl.num_programs(0) - 1

        @pl.when(i != last)
        def _():
            partial_ref[...] = jnp.sum(bce, axis=1, keepdims=True)

        @pl.when(i == last)   # only the last tile can contain padded pixels
        def _():
            lane = lax.broadcasted_iota(jnp.int32, bce.shape, 1)
            n_rem = n_valid - i * tile_p
            partial_ref[...] = jnp.sum(jnp.where(lane < n_rem, bce, 0.0),
                                       axis=1, keepdims=True)
    else:
        partial_ref[...] = jnp.sum(bce, axis=1, keepdims=True)


def bce_ranking_loss(d0, d1, judge, params, *, eps=0.1):
    """Pallas implementation of BCERankingLoss.forward (returns scalar loss)."""
    w1, b1, w2, b2, w3, b3 = params
    assert d0.shape == d1.shape == judge.shape
    n, c, h, w = d0.shape
    assert c == 1, "Dist2LogitLayer expects 1-channel distance maps"
    p = n * h * w

    f32 = jnp.float32
    d0f = d0.reshape(1, p).astype(f32)
    d1f = d1.reshape(1, p).astype(f32)
    jf = judge.reshape(1, p).astype(f32)

    # Lane-dense pixel tiling with large, generation-aware tiles.
    tile_cap, vmem_limit = _tile_cap_for_device()
    tile_p = min(tile_cap, _round_up(p, 512))
    if p > 8192:
        # Keep at least 2 grid steps so the "parallel" axis can feed both
        # TensorCores on v7x.
        tile_p = min(tile_p, _round_up((p + 1) // 2, 512))
    p_pad = _round_up(p, tile_p)
    needs_mask = p_pad != p
    if needs_mask:
        pad = ((0, 0), (0, p_pad - p))
        d0f = jnp.pad(d0f, pad)
        d1f = jnp.pad(d1f, pad)
        jf = jnp.pad(jf, pad)

    # Parameters laid out for the kernel (channels on sublanes), kept in f32.
    # Fold the (d0 - d1) feature channel into the first-layer weights:
    #   w_eff[:,0] = w[:,0] + w[:,2],  w_eff[:,1] = w[:,1] - w[:,2].
    w1m = w1.reshape(CHN_MID, 5).astype(f32)
    w1_eff = jnp.stack([w1m[:, 0] + w1m[:, 2],
                        w1m[:, 1] - w1m[:, 2],
                        w1m[:, 3],
                        w1m[:, 4]], axis=1)                         # (32, 4)
    w1p = jnp.pad(w1_eff, ((0, 0), (0, FEAT_ROWS - 4)))             # (32, 8)
    b1m = b1.reshape(CHN_MID, 1).astype(f32)
    w2m = w2.reshape(CHN_MID, CHN_MID).astype(f32)
    b2m = b2.reshape(CHN_MID, 1).astype(f32)
    w3t = jnp.transpose(w3.reshape(1, CHN_MID)).astype(f32)         # (32, 1)
    b3m = b3.reshape(1, 1).astype(f32)

    num_tiles = p_pad // tile_p
    kernel = functools.partial(_bce_ranking_kernel, n_valid=p, eps=float(eps),
                               tile_p=tile_p, needs_mask=needs_mask)

    cp_kwargs = {"dimension_semantics": ("parallel",)}
    if vmem_limit is not None:
        cp_kwargs["vmem_limit_bytes"] = int(vmem_limit)

    partials = pl.pallas_call(
        kernel,
        out_shape=jax.ShapeDtypeStruct((num_tiles, 1), f32),
        grid=(num_tiles,),
        in_specs=[
            pl.BlockSpec((1, tile_p), lambda i: (0, i)),            # d0
            pl.BlockSpec((1, tile_p), lambda i: (0, i)),            # d1
            pl.BlockSpec((1, tile_p), lambda i: (0, i)),            # judge
            pl.BlockSpec((CHN_MID, FEAT_ROWS), lambda i: (0, 0)),   # w1 (folded+padded)
            pl.BlockSpec((CHN_MID, 1), lambda i: (0, 0)),           # b1
            pl.BlockSpec((CHN_MID, CHN_MID), lambda i: (0, 0)),     # w2
            pl.BlockSpec((CHN_MID, 1), lambda i: (0, 0)),           # b2
            pl.BlockSpec((CHN_MID, 1), lambda i: (0, 0)),           # w3 (transposed)
            pl.BlockSpec((1, 1), lambda i: (0, 0)),                 # b3
        ],
        out_specs=pl.BlockSpec((1, 1), lambda i: (i, 0)),
        scratch_shapes=[pltpu.VMEM((FEAT_ROWS, tile_p), f32)],
        compiler_params=pltpu.CompilerParams(**cp_kwargs),
    )(d0f, d1f, jf, w1p, b1m, w2m, b2m, w3t, b3m)

    # Mean reduction of BCELoss (tiny final reduce done in plain JAX).
    return jnp.sum(partials) / p


def init_params(key, chn_mid=CHN_MID):
    """Deterministic Conv2d-style (kaiming-uniform-ish) init for the 1x1 convs."""
    ks = jax.random.split(key, 6)

    def u(k, shape, fan_in):
        bound = 1.0 / jnp.sqrt(fan_in)
        return jax.random.uniform(k, shape, jnp.float32, -bound, bound)

    w1 = u(ks[0], (chn_mid, 5), 5.0)
    b1 = u(ks[1], (chn_mid,), 5.0)
    w2 = u(ks[2], (chn_mid, chn_mid), float(chn_mid))
    b2 = u(ks[3], (chn_mid,), float(chn_mid))
    w3 = u(ks[4], (1, chn_mid), float(chn_mid))
    b3 = u(ks[5], (1,), float(chn_mid))
    return (w1, b1, w2, b2, w3, b3)


def reference_loss(d0, d1, judge, params, eps=0.1):
    """Plain-JAX reference matching the PyTorch module."""
    w1, b1, w2, b2, w3, b3 = params
    feats = jnp.concatenate(
        [d0, d1, d0 - d1, d0 / (d1 + eps), d1 / (d0 + eps)], axis=1)

    def conv1x1(x, wt, bias):
        return jnp.einsum('oc,nchw->nohw', wt, x) + bias[None, :, None, None]

    h = conv1x1(feats, w1, b1)
    h = jnp.where(h > 0, h, LEAKY_SLOPE * h)
    h = conv1x1(h, w2, b2)
    h = jnp.where(h > 0, h, LEAKY_SLOPE * h)
    z = conv1x1(h, w3, b3)
    logit = jax.nn.sigmoid(z)
    per = (judge + 1.0) / 2.0
    # TODO(synk): PyTorch BCELoss clamps log terms at -100; not replicated (irrelevant here).
    return jnp.mean(-(per * jnp.log(logit) + (1.0 - per) * jnp.log(1.0 - logit)))


if __name__ == "__main__":
    key = jax.random.PRNGKey(0)
    kd0, kd1, kj, kp = jax.random.split(key, 4)

    n, h, w = 2, 16, 16   # d0 / d1 / judge are 1-channel distance maps
    d0 = jnp.abs(jax.random.normal(kd0, (n, 1, h, w), jnp.float32)) * 0.3
    d1 = jnp.abs(jax.random.normal(kd1, (n, 1, h, w), jnp.float32)) * 0.3
    judge = jax.random.uniform(kj, (n, 1, h, w), jnp.float32, -1.0, 1.0)
    params = init_params(kp)

    loss = bce_ranking_loss(d0, d1, judge, params)
    jax.block_until_ready(loss)

    ref = reference_loss(d0, d1, judge, params)
    assert loss.shape == ref.shape == ()
    assert jnp.allclose(loss, ref, rtol=1e-5, atol=1e-5), (loss, ref)

    print("KERNEL_OK")
</pallas_src>

<mosaic_0001>
module attributes {stable_mosaic.version = 11 : i64} {
  func.func @_bce_ranking_kernel(%arg0: i32, %arg1: memref<1x512xf32, #tpu.memory_space<vmem>>, %arg2: memref<1x512xf32, #tpu.memory_space<vmem>>, %arg3: memref<1x512xf32, #tpu.memory_space<vmem>>, %arg4: memref<32x8xf32, #tpu.memory_space<vmem>>, %arg5: memref<32x1xf32, #tpu.memory_space<vmem>>, %arg6: memref<32x32xf32, #tpu.memory_space<vmem>>, %arg7: memref<32x1xf32, #tpu.memory_space<vmem>>, %arg8: memref<32x1xf32, #tpu.memory_space<vmem>>, %arg9: memref<1x1xf32, #tpu.memory_space<vmem>>, %arg10: memref<1x1xf32, #tpu.memory_space<vmem>>, %arg11: memref<8x512xf32, #tpu.memory_space<vmem>>) attributes {dimension_semantics = [#tpu.dimension_semantics<parallel>], iteration_bounds = array<i64: 1>, scalar_prefetch = 0 : i64, scratch_operands = 1 : i64, tpu.core_type = #tpu.core_type<tc>, window_params = [{transform_indices = @transform_0, window_bounds = array<i64: 1, 512>}, {transform_indices = @transform_1, window_bounds = array<i64: 1, 512>}, {transform_indices = @transform_2, window_bounds = array<i64: 1, 512>}, {pipeline_mode = #tpu.pipeline_mode<synchronous>, transform_indices = @transform_3, window_bounds = array<i64: 32, 8>}, {pipeline_mode = #tpu.pipeline_mode<synchronous>, transform_indices = @transform_4, window_bounds = array<i64: 32, 1>}, {pipeline_mode = #tpu.pipeline_mode<synchronous>, transform_indices = @transform_5, window_bounds = array<i64: 32, 32>}, {pipeline_mode = #tpu.pipeline_mode<synchronous>, transform_indices = @transform_6, window_bounds = array<i64: 32, 1>}, {pipeline_mode = #tpu.pipeline_mode<synchronous>, transform_indices = @transform_7, window_bounds = array<i64: 32, 1>}, {pipeline_mode = #tpu.pipeline_mode<synchronous>, transform_indices = @transform_8, window_bounds = array<i64: 1, 1>}, {transform_indices = @transform_9, window_bounds = array<i64: 1, 1>}]} {
    %c0 = arith.constant 0 : index
    %c0_0 = arith.constant 0 : index
    %0 = vector.load %arg1[%c0, %c0_0] : memref<1x512xf32, #tpu.memory_space<vmem>>, vector<1x512xf32>
    %c0_1 = arith.constant 0 : index
    %c0_2 = arith.constant 0 : index
    %1 = vector.load %arg2[%c0_1, %c0_2] : memref<1x512xf32, #tpu.memory_space<vmem>>, vector<1x512xf32>
    %c0_3 = arith.constant 0 : index
    %c0_4 = arith.constant 0 : index
    %2 = vector.load %arg3[%c0_3, %c0_4] : memref<1x512xf32, #tpu.memory_space<vmem>>, vector<1x512xf32>
    %cst = arith.constant 1.000000e-01 : f32
    %3 = vector.broadcast %cst : f32 to vector<1x512xf32>
    %4 = arith.addf %1, %3 : vector<1x512xf32>
    %5 = tpu.reciprocal %4 {approx = true} : vector<1x512xf32> -> vector<1x512xf32>
    %6 = arith.mulf %4, %5 : vector<1x512xf32>
    %cst_5 = arith.constant 2.000000e+00 : f32
    %7 = vector.broadcast %cst_5 : f32 to vector<1x512xf32>
    %8 = arith.subf %7, %6 : vector<1x512xf32>
    %9 = arith.mulf %5, %8 : vector<1x512xf32>
    %10 = arith.mulf %0, %9 : vector<1x512xf32>
    %cst_6 = arith.constant 1.000000e-01 : f32
    %11 = vector.broadcast %cst_6 : f32 to vector<1x512xf32>
    %12 = arith.addf %0, %11 : vector<1x512xf32>
    %13 = tpu.reciprocal %12 {approx = true} : vector<1x512xf32> -> vector<1x512xf32>
    %14 = arith.mulf %12, %13 : vector<1x512xf32>
    %cst_7 = arith.constant 2.000000e+00 : f32
    %15 = vector.broadcast %cst_7 : f32 to vector<1x512xf32>
    %16 = arith.subf %15, %14 : vector<1x512xf32>
    %17 = arith.mulf %13, %16 : vector<1x512xf32>
    %18 = arith.mulf %1, %17 : vector<1x512xf32>
    %c0_8 = arith.constant 0 : index
    %c0_9 = arith.constant 0 : index
    %19 = vector.load %arg11[%c0_8, %c0_9] : memref<8x512xf32, #tpu.memory_space<vmem>>, vector<1x512xf32>
    tpu.vector_store %arg11[%c0_8, %c0_9], %0 {strides = array<i32>} : memref<8x512xf32, #tpu.memory_space<vmem>>, vector<1x512xf32>,
    %c1 = arith.constant 1 : index
    %c0_10 = arith.constant 0 : index
    %20 = vector.load %arg11[%c1, %c0_10] : memref<8x512xf32, #tpu.memory_space<vmem>>, vector<1x512xf32>
    tpu.vector_store %arg11[%c1, %c0_10], %1 {strides = array<i32>} : memref<8x512xf32, #tpu.memory_space<vmem>>, vector<1x512xf32>,
    %c2 = arith.constant 2 : index
    %c0_11 = arith.constant 0 : index
    %21 = vector.load %arg11[%c2, %c0_11] : memref<8x512xf32, #tpu.memory_space<vmem>>, vector<1x512xf32>
    tpu.vector_store %arg11[%c2, %c0_11], %10 {strides = array<i32>} : memref<8x512xf32, #tpu.memory_space<vmem>>, vector<1x512xf32>,
    %c3 = arith.constant 3 : index
    %c0_12 = arith.constant 0 : index
    %22 = vector.load %arg11[%c3, %c0_12] : memref<8x512xf32, #tpu.memory_space<vmem>>, vector<1x512xf32>
    tpu.vector_store %arg11[%c3, %c0_12], %18 {strides = array<i32>} : memref<8x512xf32, #tpu.memory_space<vmem>>, vector<1x512xf32>,
    %cst_13 = arith.constant 0.000000e+00 : f32
    %23 = vector.broadcast %cst_13 : f32 to vector<4x512xf32>
    %c4 = arith.constant 4 : index
    %c0_14 = arith.constant 0 : index
    %24 = vector.load %arg11[%c4, %c0_14] : memref<8x512xf32, #tpu.memory_space<vmem>>, vector<4x512xf32>
    tpu.vector_store %arg11[%c4, %c0_14], %23 {strides = array<i32>} : memref<8x512xf32, #tpu.memory_space<vmem>>, vector<4x512xf32>,
    %c0_15 = arith.constant 0 : index
    %c0_16 = arith.constant 0 : index
    %25 = vector.load %arg4[%c0_15, %c0_16] : memref<32x8xf32, #tpu.memory_space<vmem>>, vector<32x8xf32>
    %c0_17 = arith.constant 0 : index
    %c0_18 = arith.constant 0 : index
    %26 = vector.load %arg11[%c0_17, %c0_18] : memref<8x512xf32, #tpu.memory_space<vmem>>, vector<8x512xf32>
    %cst_19 = arith.constant dense<0.000000e+00> : vector<32x512xf32>
    %27 = tpu.matmul %25, %26, %cst_19 {dimension_numbers = #tpu.dot_dimension_numbers<[1], [0], [0], [1], [0, 0, 1, 1], [], []>} : vector<32x8xf32>, vector<8x512xf32>, vector<32x512xf32> -> vector<32x512xf32>
    %c0_20 = arith.constant 0 : index
    %c0_21 = arith.constant 0 : index
    %28 = vector.load %arg5[%c0_20, %c0_21] : memref<32x1xf32, #tpu.memory_space<vmem>>, vector<32x1xf32>
    %29 = vector.broadcast %28 : vector<32x1xf32> to vector<32x512xf32>
    %30 = arith.addf %27, %29 : vector<32x512xf32>
    %cst_22 = arith.constant 2.000000e-01 : f32
    %31 = vector.broadcast %cst_22 : f32 to vector<32x512xf32>
    %32 = arith.mulf %31, %30 : vector<32x512xf32>
    %33 = arith.maximumf %30, %32 : vector<32x512xf32>
    %c0_23 = arith.constant 0 : index
    %c0_24 = arith.constant 0 : index
    %34 = vector.load %arg6[%c0_23, %c0_24] : memref<32x32xf32, #tpu.memory_space<vmem>>, vector<32x32xf32>
    %cst_25 = arith.constant dense<0.000000e+00> : vector<32x512xf32>
    %35 = tpu.matmul %34, %33, %cst_25 {dimension_numbers = #tpu.dot_dimension_numbers<[1], [0], [0], [1], [0, 0, 1, 1], [], []>} : vector<32x32xf32>, vector<32x512xf32>, vector<32x512xf32> -> vector<32x512xf32>
    %c0_26 = arith.constant 0 : index
    %c0_27 = arith.constant 0 : index
    %36 = vector.load %arg7[%c0_26, %c0_27] : memref<32x1xf32, #tpu.memory_space<vmem>>, vector<32x1xf32>
    %37 = vector.broadcast %36 : vector<32x1xf32> to vector<32x512xf32>
    %38 = arith.addf %35, %37 : vector<32x512xf32>
    %cst_28 = arith.constant 2.000000e-01 : f32
    %39 = vector.broadcast %cst_28 : f32 to vector<32x512xf32>
    %40 = arith.mulf %39, %38 : vector<32x512xf32>
    %41 = arith.maximumf %38, %40 : vector<32x512xf32>
    %c0_29 = arith.constant 0 : index
    %c0_30 = arith.constant 0 : index
    %42 = vector.load %arg8[%c0_29, %c0_30] : memref<32x1xf32, #tpu.memory_space<vmem>>, vector<32x1xf32>
    %43 = vector.broadcast %42 : vector<32x1xf32> to vector<32x512xf32>
    %44 = arith.mulf %43, %41 : vector<32x512xf32>
    %cst_31 = arith.constant dense<0.000000e+00> : vector<512xf32>
    %45 = vector.multi_reduction <add>, %44, %cst_31 [0] : vector<32x512xf32> to vector<512xf32>
    %46 = vector.shape_cast %45 : vector<512xf32> to vector<1x512xf32>
    %c0_32 = arith.constant 0 : index
    %c0_33 = arith.constant 0 : index
    %47 = vector.load %arg9[%c0_32, %c0_33] : memref<1x1xf32, #tpu.memory_space<vmem>>, vector<1x1xf32>
    %48 = vector.broadcast %47 : vector<1x1xf32> to vector<1x512xf32>
    %49 = arith.addf %46, %48 : vector<1x512xf32>
    %cst_34 = arith.constant 1.000000e+00 : f32
    %50 = vector.broadcast %cst_34 : f32 to vector<1x512xf32>
    %51 = arith.addf %2, %50 : vector<1x512xf32>
    %cst_35 = arith.constant 5.000000e-01 : f32
    %52 = vector.broadcast %cst_35 : f32 to vector<1x512xf32>
    %53 = arith.mulf %51, %52 : vector<1x512xf32>
    %54 = math.absf %49 : vector<1x512xf32>
    %cst_36 = arith.constant 0.000000e+00 : f32
    %55 = vector.broadcast %cst_36 : f32 to vector<1x512xf32>
    %56 = arith.subf %55, %54 : vector<1x512xf32>
    %57 = math.exp %56 : vector<1x512xf32>
    %58 = math.log1p %57 : vector<1x512xf32>
    %cst_37 = arith.constant 0.000000e+00 : f32
    %59 = vector.broadcast %cst_37 : f32 to vector<1x512xf32>
    %60 = arith.minimumf %49, %59 : vector<1x512xf32>
    %61 = arith.subf %60, %58 : vector<1x512xf32>
    %cst_38 = arith.constant 0.000000e+00 : f32
    %62 = vector.broadcast %cst_38 : f32 to vector<1x512xf32>
    %63 = arith.subf %62, %49 : vector<1x512xf32>
    %cst_39 = arith.constant 0.000000e+00 : f32
    %64 = vector.broadcast %cst_39 : f32 to vector<1x512xf32>
    %65 = arith.minimumf %63, %64 : vector<1x512xf32>
    %66 = arith.subf %65, %58 : vector<1x512xf32>
    %67 = arith.mulf %53, %61 : vector<1x512xf32>
    %cst_40 = arith.constant 1.000000e+00 : f32
    %68 = vector.broadcast %cst_40 : f32 to vector<1x512xf32>
    %69 = arith.subf %68, %53 : vector<1x512xf32>
    %70 = arith.mulf %69, %66 : vector<1x512xf32>
    %71 = arith.addf %67, %70 : vector<1x512xf32>
    %cst_41 = arith.constant 0.000000e+00 : f32
    %72 = vector.broadcast %cst_41 : f32 to vector<1x512xf32>
    %73 = arith.subf %72, %71 : vector<1x512xf32>
    %cst_42 = arith.constant dense<0.000000e+00> : vector<1xf32>
    %74 = vector.multi_reduction <add>, %73, %cst_42 [1] : vector<1x512xf32> to vector<1xf32>
    %75 = vector.shape_cast %74 : vector<1xf32> to vector<1x1xf32>
    %c0_43 = arith.constant 0 : index
    %c0_44 = arith.constant 0 : index
    %76 = vector.load %arg10[%c0_43, %c0_44] : memref<1x1xf32, #tpu.memory_space<vmem>>, vector<1x1xf32>
    tpu.vector_store %arg10[%c0_43, %c0_44], %75 {strides = array<i32>} : memref<1x1xf32, #tpu.memory_space<vmem>>, vector<1x1xf32>,
    return
  }
  func.func @transform_0(%arg0: i32) -> (i32, i32) {
    %c0_i32 = arith.constant 0 : i32
    %c0_i32_0 = arith.constant 0 : i32
    return %c0_i32, %arg0 : i32, i32
  }
  func.func @transform_1(%arg0: i32) -> (i32, i32) {
    %c0_i32 = arith.constant 0 : i32
    %c0_i32_0 = arith.constant 0 : i32
    return %c0_i32, %arg0 : i32, i32
  }
  func.func @transform_2(%arg0: i32) -> (i32, i32) {
    %c0_i32 = arith.constant 0 : i32
    %c0_i32_0 = arith.constant 0 : i32
    return %c0_i32, %arg0 : i32, i32
  }
  func.func @transform_3(%arg0: i32) -> (i32, i32) {
    %c0_i32 = arith.constant 0 : i32
    %c0_i32_0 = arith.constant 0 : i32
    %c0_i32_1 = arith.constant 0 : i32
    return %c0_i32, %c0_i32_0 : i32, i32
  }
  func.func @transform_4(%arg0: i32) -> (i32, i32) {
    %c0_i32 = arith.constant 0 : i32
    %c0_i32_0 = arith.constant 0 : i32
    %c0_i32_1 = arith.constant 0 : i32
    return %c0_i32, %c0_i32_0 : i32, i32
  }
  func.func @transform_5(%arg0: i32) -> (i32, i32) {
    %c0_i32 = arith.constant 0 : i32
    %c0_i32_0 = arith.constant 0 : i32
    %c0_i32_1 = arith.constant 0 : i32
    return %c0_i32, %c0_i32_0 : i32, i32
  }
  func.func @transform_6(%arg0: i32) -> (i32, i32) {
    %c0_i32 = arith.constant 0 : i32
    %c0_i32_0 = arith.constant 0 : i32
    %c0_i32_1 = arith.constant 0 : i32
    return %c0_i32, %c0_i32_0 : i32, i32
  }
  func.func @transform_7(%arg0: i32) -> (i32, i32) {
    %c0_i32 = arith.constant 0 : i32
    %c0_i32_0 = arith.constant 0 : i32
    %c0_i32_1 = arith.constant 0 : i32
    return %c0_i32, %c0_i32_0 : i32, i32
  }
  func.func @transform_8(%arg0: i32) -> (i32, i32) {
    %c0_i32 = arith.constant 0 : i32
    %c0_i32_0 = arith.constant 0 : i32
    %c0_i32_1 = arith.constant 0 : i32
    return %c0_i32, %c0_i32_0 : i32, i32
  }
  func.func @transform_9(%arg0: i32) -> (i32, i32) {
    %c0_i32 = arith.constant 0 : i32
    %c0_i32_0 = arith.constant 0 : i32
    return %arg0, %c0_i32 : i32, i32
  }
}

</mosaic_0001>

<bundles_post_ra>
// kernel: tpu_custom_call.1
= control target key start
LH: loop header
LB: loop body
LE: loop exit
PB: predicated region body
PF: predicated region fallthrough
CT: control target
= control target key end

     0   :  { %s1123_s0 = inlined_call_operand.vmem [shape: f32[1,512], index: 0, kind: input, shape index: {}]   ;;  %s1124_s1 = inlined_call_operand.vmem [shape: f32[1,512], index: 1, kind: input, shape index: {}]   ;;  %s1125_s2 = inlined_call_operand.vmem [shape: f32[1,512], index: 2, kind: input, shape index: {}]   ;;  %s1126_s3 = inlined_call_operand.vmem [shape: f32[32,8], index: 3, kind: input, shape index: {}]   ;;  %s1127_s4 = inlined_call_operand.vmem [shape: f32[32,1], index: 4, kind: input, shape index: {}]   ;;  %s1128_s5 = inlined_call_operand.vmem [shape: f32[32,32], index: 5, kind: input, shape index: {}]   ;;  %s1129_s6 = inlined_call_operand.vmem [shape: f32[32,1], index: 6, kind: input, shape index: {}]   ;;  %s1130_s7 = inlined_call_operand.vmem [shape: f32[32,1], index: 7, kind: input, shape index: {}]   ;;  %s1131_s8 = inlined_call_operand.<no memory space> [shape: f32[1,1], index: 8, kind: input, shape index: {}]   ;;  %s1132_s9 = inlined_call_operand.hbm [shape: f32[1,1], index: 9, kind: output, shape index: {}]  }
   0x1   :  { %v14_v0 = vstv %s1131_s8 }
   0x2   :  { %15 = vst [vmem:[#allocation3] sm:$0x1] %v14_v0 }
   0x3   :  { %v35_v1 = vld [vmem:[%s1123_s0] sm:$0xf]  ;;  %v50_v3 = vlaneseq  ;;  %v913_v6 = vmov 0.0   ;;  %v80_v8 = vld [vmem:[%s1127_s4 + $0x18] sm:$0xff]  ;;  %v914_v9 = vmov 0   ;;  %v78_v10 = vld [vmem:[%s1127_s4 + $0x8] sm:$0xff] }
   0x4   :  { %v36_v2 = vld [vmem:[%s1124_s1] sm:$0xf]  ;;  %v44_v5 = vadd.f32 0.1, %v35_v1  ;;  %66 = vst [vmem:[#allocation2 + $0x8] sm:$0xf0] %v913_v6  ;;  %178 = vmatprep.mubr.f32.mxu0 %v913_v6  ;;  %267 = vmatprep.mubr.f32.mxu1 %v913_v6 }
   0x5   :  { %v38_v4 = vadd.f32 0.1, %v36_v2  ;;  %65 = vst [vmem:[#allocation2] sm:$0xf0] %v913_v6  ;;  %67 = vst [vmem:[#allocation2 + $0x10] sm:$0xf0] %v913_v6  ;;  %869 = vset.pattern.permute.xlu0 %v914_v9  ;;  %870 = vset.pattern.permute.xlu1 %v914_v9 }
   0x6   :  { %68 = vst [vmem:[#allocation2 + $0x18] sm:$0xf0] %v913_v6  ;;  %vm983_vm0 = vcmp.lt.s32.totalorder %v50_v3, 512  ;;  %98 = vperm.xlu0 %869, %v80_v8   ;;  %88 = vperm.xlu1 %870, %v78_v10   ;;  %v79_v11 = vld [vmem:[%s1127_s4 + $0x10] sm:$0xff]  ;;  %v77_v12 = vld [vmem:[%s1127_s4] sm:$0xff] }
   0x7   :  { %871 = vrcp.f32 %v38_v4  ;;  %54 = vst.msk [vmem:[#allocation2] ss:$8 sm:$0xf] %vm983_vm0, %v35_v1  ;;  %57 = vst.msk [vmem:[#allocation2 + $0x1] ss:$8 sm:$0xf] %vm983_vm0, %v36_v2 }
   0x8   :  { %873 = vrcp.f32 %v44_v5 }
   0x9   :  { %16 = vsyncpa [#allocation5], 0  ;;  %v328_v13 = vld [vmem:[%s1129_s6] sm:$0xff]  ;;  %v329_v14 = vld [vmem:[%s1129_s6 + $0x8] sm:$0xff]  ;;  %vm101_vm1 = vcmask 64512   ;;  %vm352_vm2 = vcmask 261120  }
   0xa   :  { %93 = vperm.xlu0 %869, %v79_v11   ;;  %83 = vperm.xlu1 %870, %v77_v12   ;;  %v330_v15 = vld [vmem:[%s1129_s6 + $0x10] sm:$0xff]  ;;  %v331_v16 = vld [vmem:[%s1129_s6 + $0x18] sm:$0xff]  ;;  %v575_v20 = vld [vmem:[%s1130_s7] sm:$0xff]  ;;  %vm823_vm7 = vcmask 1040384   ;;  %vm833_vm8 = vcmask 0  }
   0xb   :  { %v576_v21 = vld [vmem:[%s1130_s7 + $0x8] sm:$0xff]  ;;  %v577_v26 = vld [vmem:[%s1130_s7 + $0x10] sm:$0xff]  ;;  %v578_v27 = vld [vmem:[%s1130_s7 + $0x18] sm:$0xff] }
   0xc   :  { %v651_v31 = vld [vmem:[#allocation3] sm:$0x1]  ;;  %v70_v37 = vld [vmem:[%s1126_s3 + $0x8] sm:$0xff]  ;;  %v71_v38 = vld [vmem:[%s1126_s3 + $0x10] sm:$0xff] }
   0xd   :  { %v69_v32 = vld [vmem:[%s1126_s3] sm:$0xff]  ;;  %v72_v39 = vld [vmem:[%s1126_s3 + $0x18] sm:$0xff] }
   0xe   :  { %334 = vperm.xlu0 %869, %v328_v13   ;;  %339 = vperm.xlu1 %870, %v329_v14  }
  0x12   :  { %344 = vperm.xlu0 %869, %v330_v15   ;;  %349 = vperm.xlu1 %870, %v331_v16  }
  0x14   :  { %v872_v17 = vpop.eup %871 }
  0x15   :  { %v874_v18 = vpop.eup %873  ;;  %v40_v19 = vmul.f32 %v872_v17, %v38_v4 }
  0x16   :  { %v46_v22 = vmul.f32 %v874_v18, %v44_v5  ;;  %581 = vperm.xlu0 %869, %v575_v20   ;;  %586 = vperm.xlu1 %870, %v576_v21  }
  0x17   :  { %v41_v23 = vsub.f32 2.0, %v40_v19 }
  0x18   :  { %v47_v24 = vsub.f32 2.0, %v46_v22 }
  0x19   :  { %v42_v25 = vmul.f32 %v872_v17, %v41_v23 }
  0x1a   :  { %v48_v28 = vmul.f32 %v874_v18, %v47_v24  ;;  %591 = vperm.xlu0 %869, %v577_v26   ;;  %596 = vperm.xlu1 %870, %v578_v27  }
  0x1b   :  { %v43_v29 = vmul.f32 %v42_v25, %v35_v1 }
  0x1c   :  { %v49_v30 = vmul.f32 %v48_v28, %v36_v2 }
  0x1d   :  { %60 = vst.msk [vmem:[#allocation2 + $0x2] ss:$8 sm:$0xf] %vm983_vm0, %v43_v29 }
  0x1e   :  { %63 = vst.msk [vmem:[#allocation2 + $0x3] ss:$8 sm:$0xf] %vm983_vm0, %v49_v30  ;;  %654 = vperm.xlu0 %869, %v651_v31  }
  0x25   :  { %v74_v33 = vld [vmem:[#allocation2 + $0x8] sm:$0xff]  ;;  %v76_v34 = vld [vmem:[#allocation2 + $0x18] sm:$0xff]  ;;  %v73_v35 = vld [vmem:[#allocation2] sm:$0xff] }
  0x26   :  { %144 = vmatprep.subr.mxu0 %v74_v33  ;;  %233 = vmatprep.subr.mxu1 %v76_v34  ;;  %v75_v36 = vld [vmem:[#allocation2 + $0x10] sm:$0xff] }
  0x27   :  { %145 = vmatpush1.msra.mxu0 %v73_v35  ;;  %234 = vmatpush1.msra.mxu1 %v75_v36 }
  0x28   :  { %849 = vmatmul.mubr.msk.f32.vlgmr.msra.gmra.mxu0 %vm101_vm1, %v69_v32  ;;  %853 = vmatmul.mubr.msk.f32.vlgmr.msra.gmra.mxu1 %vm101_vm1, %v69_v32 }
  0x29   :  { %184 = vmatprep.mubr.f32.mxu0 %v913_v6  ;;  %273 = vmatprep.mubr.f32.mxu1 %v913_v6 }
  0x2c   :  { %850 = vmatmul.mubr.msk.f32.gmra.mxu0 %vm101_vm1, %v70_v37  ;;  %854 = vmatmul.mubr.msk.f32.gmra.mxu1 %vm101_vm1, %v70_v37 }
  0x2d   :  { %190 = vmatprep.mubr.f32.mxu0 %v913_v6  ;;  %279 = vmatprep.mubr.f32.mxu1 %v913_v6 }
  0x30   :  { %851 = vmatmul.mubr.msk.f32.gmra.mxu0 %vm101_vm1, %v71_v38  ;;  %855 = vmatmul.mubr.msk.f32.gmra.mxu1 %vm101_vm1, %v71_v38 }
  0x31   :  { %196 = vmatprep.mubr.f32.mxu0 %v913_v6  ;;  %285 = vmatprep.mubr.f32.mxu1 %v913_v6 }
  0x34   :  { %852 = vmatmul.mubr.msk.f32.gmra.mxu0 %vm101_vm1, %v72_v39  ;;  %856 = vmatmul.mubr.msk.f32.gmra.mxu1 %vm101_vm1, %v72_v39 }
  0x35   :  { %429 = vmatprep.mubr.f32.mxu0 %v913_v6  ;;  %518 = vmatprep.mubr.f32.mxu1 %v913_v6 }
  0x81   :  { %v99_v46 = vpop.permute.xlu0 %98  ;;  %v89_v49 = vpop.permute.xlu1 %88 }
  0x85   :  { %v94_v54 = vpop.permute.xlu0 %93  ;;  %v84_v58 = vpop.permute.xlu1 %83 }
  0xe8   :  { %v180_v40 = vpop.f32.mrf.mxu0  ;;  %v269_v41 = vpop.f32.mrf.mxu1 }
  0xe9   :  { %v181_v18 = vadd.f32 %v180_v40, %v84_v58  ;;  %v270_v19 = vadd.f32 %v269_v41, %v84_v58 }
  0xea   :  { %v182_v42 = vpop.f32.mrf.mxu0  ;;  %v271_v43 = vpop.f32.mrf.mxu1 }
  0xeb   :  { %v183_v62 = vadd.f32 %v182_v42, %v84_v58  ;;  %v272_v14 = vadd.f32 %v271_v43, %v84_v58  ;;  %v292_v34 = vmul.f32 0.2, %v181_v18  ;;  %v294_v35 = vmul.f32 0.2, %v270_v19 }
  0xec   :  { %v186_v44 = vpop.f32.mrf.mxu0  ;;  %v275_v45 = vpop.f32.mrf.mxu1 }
  0xed   :  { %v187_v63 = vadd.f32 %v186_v44, %v89_v49  ;;  %v276_v10 = vadd.f32 %v275_v45, %v89_v49  ;;  %v293_v30 = vmul.f32 0.2, %v183_v62  ;;  %v295_v31 = vmul.f32 0.2, %v272_v14 }
  0xee   :  { %v188_v47 = vpop.f32.mrf.mxu0  ;;  %v277_v48 = vpop.f32.mrf.mxu1  ;;  %v308_v44 = vmax.f32 %v181_v18, %v292_v34  ;;  %v310_v45 = vmax.f32 %v270_v19, %v294_v35 }
  0xef   :  { %v189_v5 = vadd.f32 %v188_v47, %v89_v49  ;;  %v278_v7 = vadd.f32 %v277_v48, %v89_v49  ;;  %v296_v26 = vmul.f32 0.2, %v187_v63  ;;  %v298_v27 = vmul.f32 0.2, %v276_v10  ;;  %v325_v47 = vld [vmem:[%s1128_s5 + $0x8] sm:$0xff]  ;;  %v326_v48 = vld [vmem:[%s1128_s5 + $0x10] sm:$0xff] }
  0xf0   :  { %v192_v50 = vpop.f32.mrf.mxu0  ;;  %v281_v51 = vpop.f32.mrf.mxu1  ;;  %v309_v42 = vmax.f32 %v183_v62, %v293_v30  ;;  %v311_v43 = vmax.f32 %v272_v14, %v295_v31  ;;  %v327_v49 = vld [vmem:[%s1128_s5 + $0x18] sm:$0xff] }
  0xf1   :  { %v193_v0 = vadd.f32 %v192_v50, %v94_v54  ;;  %v282_v1 = vadd.f32 %v281_v51, %v94_v54  ;;  %v297_v22 = vmul.f32 0.2, %v189_v5  ;;  %v299_v23 = vmul.f32 0.2, %v278_v7  ;;  %v335_v50 = vpop.permute.xlu0 %334 }
  0xf2   :  { %v194_v52 = vpop.f32.mrf.mxu0  ;;  %v283_v53 = vpop.f32.mrf.mxu1  ;;  %v312_v40 = vmax.f32 %v187_v63, %v296_v26  ;;  %v314_v41 = vmax.f32 %v276_v10, %v298_v27 }
  0xf3   :  { %v195_v55 = vadd.f32 %v194_v52, %v94_v54  ;;  %v284_v59 = vadd.f32 %v283_v53, %v94_v54  ;;  %v300_v20 = vmul.f32 0.2, %v193_v0  ;;  %v302_v21 = vmul.f32 0.2, %v282_v1  ;;  %v340_v53 = vpop.permute.xlu1 %339 }
  0xf4   :  { %v198_v56 = vpop.f32.mrf.mxu0  ;;  %v287_v57 = vpop.f32.mrf.mxu1  ;;  %v313_v38 = vmax.f32 %v189_v5, %v297_v22  ;;  %v315_v39 = vmax.f32 %v278_v7, %v299_v23 }
  0xf5   :  { %v199_v60 = vadd.f32 %v198_v56, %v99_v46  ;;  %v288_v61 = vadd.f32 %v287_v57, %v99_v46  ;;  %v301_v11 = vmul.f32 0.2, %v195_v55  ;;  %v303_v15 = vmul.f32 0.2, %v284_v59  ;;  %v345_v58 = vpop.permute.xlu0 %344 }
  0xf6   :  { %v200_v2 = vpop.f32.mrf.mxu0  ;;  %v289_v4 = vpop.f32.mrf.mxu1  ;;  %v316_v36 = vmax.f32 %v193_v0, %v300_v20  ;;  %v318_v37 = vmax.f32 %v282_v1, %v302_v21 }
  0xf7   :  { %v201_v8 = vadd.f32 %v200_v2, %v99_v46  ;;  %v290_v9 = vadd.f32 %v289_v4, %v99_v46  ;;  %v304_v12 = vmul.f32 0.2, %v199_v60  ;;  %v306_v13 = vmul.f32 0.2, %v288_v61  ;;  %v324_v46 = vld [vmem:[%s1128_s5] sm:$0xff]  ;;  %v350_v5 = vpop.permute.xlu1 %349 }
  0xf8   :  { %v317_v32 = vmax.f32 %v195_v55, %v301_v11  ;;  %v319_v33 = vmax.f32 %v284_v59, %v303_v15 }
  0xf9   :  { %v305_v16 = vmul.f32 0.2, %v201_v8  ;;  %v307_v17 = vmul.f32 0.2, %v290_v9  ;;  %v320_v28 = vmax.f32 %v199_v60, %v304_v12  ;;  %v322_v29 = vmax.f32 %v288_v61, %v306_v13  ;;  %v582_v15 = vpop.permute.xlu0 %581 }
  0xfb   :  { %v321_v24 = vmax.f32 %v201_v8, %v305_v16  ;;  %v323_v25 = vmax.f32 %v290_v9, %v307_v17 }
  0xfd   :  { %389 = vmatprep.subr.mxu0 %v321_v24  ;;  %478 = vmatprep.subr.mxu1 %v323_v25 }
  0xfe   :  { %390 = vmatpush1.msra.mxu0 %v320_v28  ;;  %479 = vmatpush1.msra.mxu1 %v322_v29 }
  0xff   :  { %391 = vmatprep.subr.mxu0 %v317_v32  ;;  %480 = vmatprep.subr.mxu1 %v319_v33 }
 0x100   :  { %392 = vmatpush1.msra.mxu0 %v316_v36  ;;  %481 = vmatpush1.msra.mxu1 %v318_v37 }
 0x101   :  { %393 = vmatprep.subr.mxu0 %v313_v38  ;;  %482 = vmatprep.subr.mxu1 %v315_v39 }
 0x102   :  { %394 = vmatpush1.msra.mxu0 %v312_v40  ;;  %483 = vmatpush1.msra.mxu1 %v314_v41  ;;  %v587_v40 = vpop.permute.xlu1 %586 }
 0x103   :  { %395 = vmatprep.subr.mxu0 %v309_v42  ;;  %484 = vmatprep.subr.mxu1 %v311_v43 }
 0x104   :  { %396 = vmatpush1.msra.mxu0 %v308_v44  ;;  %485 = vmatpush1.msra.mxu1 %v310_v45 }
 0x105   :  { %857 = vmatmul.mubr.msk.f32.vlgmr.msra.gmra.mxu0 %vm352_vm2, %v324_v46  ;;  %861 = vmatmul.mubr.msk.f32.vlgmr.msra.gmra.mxu1 %vm352_vm2, %v324_v46 }
 0x106   :  { %435 = vmatprep.mubr.f32.mxu0 %v913_v6  ;;  %524 = vmatprep.mubr.f32.mxu1 %v913_v6 }
 0x109   :  { %858 = vmatmul.mubr.msk.f32.gmra.mxu0 %vm352_vm2, %v325_v47  ;;  %862 = vmatmul.mubr.msk.f32.gmra.mxu1 %vm352_vm2, %v325_v47 }
 0x10a   :  { %441 = vmatprep.mubr.f32.mxu0 %v913_v6  ;;  %530 = vmatprep.mubr.f32.mxu1 %v913_v6 }
 0x10d   :  { %859 = vmatmul.mubr.msk.f32.gmra.mxu0 %vm352_vm2, %v326_v48  ;;  %863 = vmatmul.mubr.msk.f32.gmra.mxu1 %vm352_vm2, %v326_v48 }
 0x10e   :  { %447 = vmatprep.mubr.f32.mxu0 %v913_v6  ;;  %536 = vmatprep.mubr.f32.mxu1 %v913_v6 }
 0x111   :  { %860 = vmatmul.mubr.msk.f32.gmra.mxu0 %vm352_vm2, %v327_v49  ;;  %864 = vmatmul.mubr.msk.f32.gmra.mxu1 %vm352_vm2, %v327_v49  ;;  %v592_v49 = vpop.permute.xlu0 %591 }
 0x1c5   :  { %v431_v51 = vpop.f32.mrf.mxu0  ;;  %v520_v52 = vpop.f32.mrf.mxu1 }
 0x1c6   :  { %v432_v54 = vadd.f32 %v431_v51, %v335_v50  ;;  %v521_v55 = vadd.f32 %v520_v52, %v335_v50 }
 0x1c7   :  { %v433_v56 = vpop.f32.mrf.mxu0  ;;  %v522_v57 = vpop.f32.mrf.mxu1 }
 0x1c8   :  { %v434_v59 = vadd.f32 %v433_v56, %v335_v50  ;;  %v523_v60 = vadd.f32 %v522_v57, %v335_v50  ;;  %v543_v62 = vmul.f32 0.2, %v432_v54  ;;  %v545_v63 = vmul.f32 0.2, %v521_v55 }
 0x1c9   :  { %v437_v6 = vpop.f32.mrf.mxu0  ;;  %v526_v61 = vpop.f32.mrf.mxu1 }
 0x1ca   :  { %v438_v0 = vadd.f32 %v437_v6, %v340_v53  ;;  %v527_v1 = vadd.f32 %v526_v61, %v340_v53  ;;  %v544_v7 = vmul.f32 0.2, %v434_v59  ;;  %v546_v8 = vmul.f32 0.2, %v523_v60 }
 0x1cb   :  { %v439_v2 = vpop.f32.mrf.mxu0  ;;  %v528_v4 = vpop.f32.mrf.mxu1  ;;  %v559_v16 = vmax.f32 %v432_v54, %v543_v62  ;;  %v561_v17 = vmax.f32 %v521_v55, %v545_v63 }
 0x1cc   :  { %v547_v9 = vmul.f32 0.2, %v438_v0  ;;  %v549_v10 = vmul.f32 0.2, %v527_v1  ;;  %v440_v11 = vadd.f32 %v439_v2, %v340_v53  ;;  %v529_v12 = vadd.f32 %v528_v4, %v340_v53 }
 0x1cd   :  { %v443_v13 = vpop.f32.mrf.mxu0  ;;  %v532_v14 = vpop.f32.mrf.mxu1  ;;  %v560_v30 = vmax.f32 %v434_v59, %v544_v7  ;;  %v562_v31 = vmax.f32 %v523_v60, %v546_v8  ;;  %v599_v41 = vmul.f32 %v582_v15, %v559_v16  ;;  %v601_v42 = vmul.f32 %v582_v15, %v561_v17 }
 0x1ce   :  { %v444_v18 = vadd.f32 %v443_v13, %v345_v58  ;;  %v533_v19 = vadd.f32 %v532_v14, %v345_v58  ;;  %v563_v20 = vmax.f32 %v438_v0, %v547_v9  ;;  %v565_v21 = vmax.f32 %v527_v1, %v549_v10  ;;  %v597_v8 = vpop.permute.xlu1 %596 }
 0x1cf   :  { %v548_v22 = vmul.f32 0.2, %v440_v11  ;;  %v550_v23 = vmul.f32 0.2, %v529_v12  ;;  %v445_v24 = vpop.f32.mrf.mxu0  ;;  %v534_v25 = vpop.f32.mrf.mxu1  ;;  %v600_v50 = vmul.f32 %v582_v15, %v560_v30  ;;  %v602_v51 = vmul.f32 %v582_v15, %v562_v31 }
 0x1d0   :  { %v551_v26 = vmul.f32 0.2, %v444_v18  ;;  %v553_v27 = vmul.f32 0.2, %v533_v19  ;;  %v446_v28 = vadd.f32 %v445_v24, %v345_v58  ;;  %v535_v29 = vadd.f32 %v534_v25, %v345_v58 }
 0x1d1   :  { %v564_v32 = vmax.f32 %v440_v11, %v548_v22  ;;  %v566_v33 = vmax.f32 %v529_v12, %v550_v23  ;;  %v449_v34 = vpop.f32.mrf.mxu0  ;;  %v538_v35 = vpop.f32.mrf.mxu1  ;;  %v603_v43 = vmul.f32 %v587_v40, %v563_v20  ;;  %v605_v44 = vmul.f32 %v587_v40, %v565_v21 }
 0x1d2   :  { %v567_v36 = vmax.f32 %v444_v18, %v551_v26  ;;  %v569_v37 = vmax.f32 %v533_v19, %v553_v27  ;;  %v552_v38 = vmul.f32 0.2, %v446_v28  ;;  %v554_v39 = vmul.f32 0.2, %v535_v29 }
 0x1d3   :  { %v451_v47 = vpop.f32.mrf.mxu0  ;;  %v540_v48 = vpop.f32.mrf.mxu1  ;;  %v450_v52 = vadd.f32 %v449_v34, %v350_v5  ;;  %v539_v53 = vadd.f32 %v538_v35, %v350_v5  ;;  %v604_v54 = vmul.f32 %v587_v40, %v564_v32  ;;  %v606_v55 = vmul.f32 %v587_v40, %v566_v33 }
 0x1d4   :  { %v568_v45 = vmax.f32 %v446_v28, %v552_v38  ;;  %v570_v46 = vmax.f32 %v535_v29, %v554_v39  ;;  %v607_v56 = vmul.f32 %v592_v49, %v567_v36  ;;  %v609_v57 = vmul.f32 %v592_v49, %v569_v37  ;;  %v655_v36 = vpop.permute.xlu0 %654 }
 0x1d5   :  { %v555_v58 = vmul.f32 0.2, %v450_v52  ;;  %v557_v59 = vmul.f32 0.2, %v539_v53  ;;  %v452_v60 = vadd.f32 %v451_v47, %v350_v5  ;;  %v541_v6 = vadd.f32 %v540_v48, %v350_v5 }
 0x1d6   :  { %v615_v61 = vadd.f32 %v603_v43, %v599_v41  ;;  %v633_v62 = vadd.f32 %v605_v44, %v601_v42  ;;  %v608_v63 = vmul.f32 %v592_v49, %v568_v45  ;;  %v610_v0 = vmul.f32 %v592_v49, %v570_v46 }
 0x1d7   :  { %v571_v1 = vmax.f32 %v450_v52, %v555_v58  ;;  %v573_v2 = vmax.f32 %v539_v53, %v557_v59  ;;  %v556_v4 = vmul.f32 0.2, %v452_v60  ;;  %v558_v7 = vmul.f32 0.2, %v541_v6 }
 0x1d8   :  { %v624_v9 = vadd.f32 %v604_v54, %v600_v50  ;;  %v642_v10 = vadd.f32 %v606_v55, %v602_v51  ;;  %v616_v11 = vadd.f32 %v615_v61, %v607_v56  ;;  %v634_v12 = vadd.f32 %v633_v62, %v609_v57 }
 0x1d9   :  { %v611_v13 = vmul.f32 %v597_v8, %v571_v1  ;;  %v613_v14 = vmul.f32 %v597_v8, %v573_v2  ;;  %v572_v15 = vmax.f32 %v452_v60, %v556_v4  ;;  %v574_v16 = vmax.f32 %v541_v6, %v558_v7 }
 0x1da   :  { %v625_v17 = vadd.f32 %v624_v9, %v608_v63  ;;  %v643_v18 = vadd.f32 %v642_v10, %v610_v0  ;;  %v1086_v26 = vshrl.u32 %v50_v3, 7 }
 0x1db   :  { %v617_v5 = vadd.f32 %v616_v11, %v611_v13  ;;  %v635_v19 = vadd.f32 %v634_v12, %v613_v14  ;;  %v612_v20 = vmul.f32 %v597_v8, %v572_v15  ;;  %v614_v21 = vmul.f32 %v597_v8, %v574_v16 }
 0x1dc   :  { %v659_v35 = vsub.s32 0, %v1086_v26  ;;  %v915_v14 = vmov 1966171168  }
 0x1dd   :  { %v618_v22 = vrot.slane %v617_v5, 4  ;;  %v636_v23 = vrot.slane %v635_v19, 4  ;;  %v626_v24 = vadd.f32 %v625_v17, %v612_v20  ;;  %v644_v25 = vadd.f32 %v643_v18, %v614_v21  ;;  %v37_v18 = vld [vmem:[%s1125_s2] sm:$0xf]  ;;  %s916_s2 = smov [#allocation4]  }
 0x1de   :  { %v660_v44 = vrot.slane %v655_v36, %v659_v35  ;;  %v746_v15 = vunpack.c.l.s4 %v915_v14  ;;  %s841_s25 = sshll.u32 %s916_s2, 4  ;;  %s842_s25 = int_to_ptr.vmem [resolvable:$true] %s841_s25 }
 0x1df   :  { %v619_v27 = vadd.f32 %v618_v22, %v617_v5  ;;  %v637_v28 = vadd.f32 %v636_v23, %v635_v19  ;;  %v627_v29 = vrot.slane %v626_v24, 4  ;;  %v645_v30 = vrot.slane %v644_v25, 4  ;;  %s891_s26 = scalar_lea.vmem %s842_s25, 16  ;;  %s895_s27 = scalar_lea.vmem %s842_s25, 32 }
 0x1e0   :  { %v747_v22 = vunpack.c.0.s8 %v746_v15  ;;  %p892_p0 = scmp.ne.s32.totalorder %s842_s25, %s891_s26  ;;  %p896_p1 = scmp.lt.s32.totalorder %s842_s25, %s842_s25 }
 0x1e1   :  { %v620_v31 = vrot.slane %v619_v27, 2  ;;  %v638_v32 = vrot.slane %v637_v28, 2  ;;  %v628_v33 = vadd.f32 %v627_v29, %v626_v24  ;;  %v646_v34 = vadd.f32 %v645_v30, %v644_v25  ;;  %p897_p2 = scmp.lt.s32.totalorder %s895_s27, %s891_s26 }
 0x1e2   :  { %v665_v25 = vadd.f32 1.0, %v37_v18 }
 0x1e3   :  { %v621_v37 = vadd.f32 %v620_v31, %v619_v27  ;;  %v639_v38 = vadd.f32 %v638_v32, %v637_v28  ;;  %v629_v39 = vrot.slane %v628_v33, 2  ;;  %v647_v40 = vrot.slane %v646_v34, 2  ;;  %p898_p3 = por %p897_p2, %p896_p1 }
 0x1e5   :  { %v622_v41 = vrot.slane %v621_v37, 1  ;;  %v640_v42 = vrot.slane %v639_v38, 1  ;;  %v630_v43 = vadd.f32 %v629_v39, %v628_v33  ;;  %v648_v3 = vadd.f32 %v647_v40, %v646_v34  ;;  %p899_p4 = pnand %p898_p3, %p892_p0 }
 0x1e7   :  { %v623_v45 = vadd.f32 %v622_v41, %v621_v37  ;;  %v641_v46 = vadd.f32 %v640_v42, %v639_v38  ;;  %v631_v47 = vrot.slane %v630_v43, 1  ;;  %v649_v48 = vrot.slane %v648_v3, 1 }
 0x1e8   :  { %v750_v42 = vsub.s32 %v747_v22, %v1086_v26  ;;  %v813_v22 = vsub.s32 2, %v1086_v26 }
 0x1e9   :  { %v1091_v49 = vadd.f32 %v660_v44, %v623_v45  ;;  %v1093_v50 = vadd.f32 %v660_v44, %v641_v46  ;;  %v632_v51 = vadd.f32 %v631_v47, %v630_v43  ;;  %v650_v52 = vadd.f32 %v649_v48, %v648_v3 }
 0x1eb   :  { %v667_v53 = vand.u32 2147483647, %v1091_v49  ;;  %v669_v54 = vand.u32 2147483647, %v1093_v50  ;;  %v1097_v55 = vadd.f32 %v660_v44, %v632_v51  ;;  %v1099_v56 = vadd.f32 %v660_v44, %v650_v52 }
 0x1ec   :  { %v727_v16 = vsub.f32 0.0, %v1091_v49  ;;  %v729_v5 = vsub.f32 0.0, %v1093_v50  ;;  %v719_v24 = vmin.f32 %v1091_v49, 0.0  ;;  %v721_v29 = vmin.f32 %v1093_v50, 0.0 }
 0x1ed   :  { %v671_v57 = vsub.f32 0.0, %v667_v53  ;;  %v673_v58 = vsub.f32 0.0, %v669_v54  ;;  %v668_v59 = vand.u32 2147483647, %v1097_v55  ;;  %v670_v61 = vand.u32 2147483647, %v1099_v56 }
 0x1ee   :  { %v731_v27 = vmin.f32 %v727_v16, 0.0  ;;  %v728_v30 = vsub.f32 0.0, %v1097_v55  ;;  %v733_v33 = vmin.f32 %v729_v5, 0.0  ;;  %v730_v36 = vsub.f32 0.0, %v1099_v56 }
 0x1ef   :  { %v675_v60 = vmul.f32 1.442695, %v671_v57  ;;  %v679_v6 = vmul.f32 1.442695, %v673_v58  ;;  %v672_v62 = vsub.f32 0.0, %v668_v59  ;;  %v674_v63 = vsub.f32 0.0, %v670_v61 }
 0x1f0   :  { %v720_v47 = vmin.f32 %v1097_v55, 0.0  ;;  %v732_v48 = vmin.f32 %v728_v30, 0.0  ;;  %v722_v52 = vmin.f32 %v1099_v56, 0.0 }
 0x1f1   :  { %875 = vpow2.f32 %v675_v60  ;;  %v677_v0 = vmul.f32 1.442695, %v672_v62  ;;  %v681_v1 = vmul.f32 1.442695, %v674_v63  ;;  %v734_v60 = vmin.f32 %v730_v36, 0.0 }
 0x1f2   :  { %877 = vpow2.f32 %v679_v6 }
 0x1f3   :  { %879 = vpow2.f32 %v677_v0 }
 0x1f4   :  { %881 = vpow2.f32 %v681_v1 }
 0x1fe   :  { %v876_v2 = vpop.eup %875 }
 0x1ff   :  { %v878_v4 = vpop.eup %877  ;;  %v683_v7 = vadd.f32 1.0, %v876_v2  ;;  %v686_v13 = vmul.f32 -0.5, %v876_v2  ;;  %v689_v23 = vand.u32 2147483647, %v876_v2 }
 0x200   :  { %v701_v8 = vadd.f32 1.0, %v878_v4  ;;  %v880_v9 = vpop.eup %879  ;;  %v704_v17 = vmul.f32 -0.5, %v878_v4  ;;  %v707_v32 = vand.u32 2147483647, %v878_v4 }
 0x201   :  { %883 = vlog2.f32 %v683_v7  ;;  %v882_v10 = vpop.eup %881  ;;  %v692_v11 = vadd.f32 1.0, %v880_v9  ;;  %v695_v19 = vmul.f32 -0.5, %v880_v9  ;;  %v687_v20 = vadd.f32 1.0, %v686_v13 }
 0x202   :  { %885 = vlog2.f32 %v701_v8  ;;  %v710_v12 = vadd.f32 1.0, %v882_v10  ;;  %v713_v21 = vmul.f32 -0.5, %v882_v10  ;;  %v705_v28 = vadd.f32 1.0, %v704_v17 }
 0x203   :  { %887 = vlog2.f32 %v692_v11  ;;  %v696_v34 = vadd.f32 1.0, %v695_v19  ;;  %v688_v39 = vmul.f32 %v876_v2, %v687_v20  ;;  %v698_v40 = vand.u32 2147483647, %v880_v9 }
 0x204   :  { %889 = vlog2.f32 %v710_v12  ;;  %v714_v41 = vadd.f32 1.0, %v713_v21  ;;  %vm690_vm3 = vcmp.lt.f32.partialorder %v689_v23, 0.0004427343  ;;  %v716_v3 = vand.u32 2147483647, %v882_v10 }
 0x205   :  { %v706_v46 = vmul.f32 %v878_v4, %v705_v28  ;;  %vm708_vm4 = vcmp.lt.f32.partialorder %v707_v32, 0.0004427343  ;;  %v697_v51 = vmul.f32 %v880_v9, %v696_v34  ;;  %vm699_vm5 = vcmp.lt.f32.partialorder %v698_v40, 0.0004427343 }
 0x206   :  { %v715_v57 = vmul.f32 %v882_v10, %v714_v41  ;;  %vm717_vm6 = vcmp.lt.f32.partialorder %v716_v3, 0.0004427343  ;;  %v666_v8 = vmul.f32 0.5, %v665_v25  ;;  %v809_v21 = vsub.s32 1, %v1086_v26 }
 0x208   :  { %v769_v15 = vsub.f32 1.0, %v666_v8 }
 0x20e   :  { %v884_v31 = vpop.eup %883 }
 0x20f   :  { %v886_v37 = vpop.eup %885  ;;  %v685_v38 = vmul.f32 0.6931472, %v884_v31 }
 0x210   :  { %v703_v43 = vmul.f32 0.6931472, %v886_v37  ;;  %v888_v44 = vpop.eup %887 }
 0x211   :  { %v691_v45 = vsel %vm690_vm3, %v688_v39, %v685_v38  ;;  %v890_v49 = vpop.eup %889  ;;  %v694_v50 = vmul.f32 0.6931472, %v888_v44 }
 0x212   :  { %v709_v53 = vsel %vm708_vm4, %v706_v46, %v703_v43  ;;  %v712_v54 = vmul.f32 0.6931472, %v890_v49  ;;  %v723_v58 = vsub.f32 %v719_v24, %v691_v45  ;;  %v735_v6 = vsub.f32 %v731_v27, %v691_v45 }
 0x213   :  { %v700_v59 = vsel %vm699_vm5, %v697_v51, %v694_v50  ;;  %v725_v55 = vsub.f32 %v721_v29, %v709_v53  ;;  %v737_v0 = vsub.f32 %v733_v33, %v709_v53  ;;  %v817_v24 = vsub.s32 3, %v1086_v26 }
 0x214   :  { %v724_v61 = vsub.f32 %v720_v47, %v700_v59  ;;  %v736_v62 = vsub.f32 %v732_v48, %v700_v59  ;;  %v718_v63 = vsel %vm717_vm6, %v715_v57, %v712_v54 }
 0x215   :  { %v726_v1 = vsub.f32 %v722_v52, %v718_v63  ;;  %v738_v2 = vsub.f32 %v734_v60, %v718_v63 }
 0x216   :  { %v743_v4 = vcombine.low %v723_v58, %v724_v61  ;;  %v774_v7 = vcombine.low %v735_v6, %v736_v62 }
 0x217   :  { %v744_v56 = vcombine.low %v725_v55, %v726_v1  ;;  %v775_v9 = vcombine.low %v737_v0, %v738_v2 }
 0x218   :  { %v751_v11 = vrot.slane %v743_v4, %v750_v42  ;;  %v782_v12 = vrot.slane %v774_v7, %v750_v42 }
 0x219   :  { %v758_v10 = vrot.slane %v744_v56, %v750_v42  ;;  %v789_v13 = vrot.slane %v775_v9, %v750_v42 }
 0x21b   :  { %v759_v14 = vcombine.low %v751_v11, %v758_v10  ;;  %v790_v16 = vcombine.low %v782_v12, %v789_v13 }
 0x21d   :  { %v766_v17 = vrot.slane %v759_v14, %v750_v42  ;;  %v797_v18 = vrot.slane %v790_v16, %v750_v42 }
 0x21f   :  { %v768_v5 = vmul.f32 %v766_v17, %v666_v8  ;;  %v799_v19 = vmul.f32 %v797_v18, %v769_v15 }
 0x221   :  { %v800_v20 = vadd.f32 %v799_v19, %v768_v5 }
 0x223   :  { %v801_v23 = vsub.f32 0.0, %v800_v20 }
 0x225   :  { %v806_v25 = vrot.slane %v801_v23, %v659_v35  ;;  %v810_v27 = vrot.slane %v801_v23, %v809_v21  ;;  %v814_v28 = vrot.slane %v801_v23, %v813_v22  ;;  %v818_v29 = vrot.slane %v801_v23, %v817_v24 }
 0x227   :  { %v824_v30 = vsel %vm823_vm7, %v806_v25, 0.0  ;;  %v825_v31 = vsel %vm823_vm7, %v810_v27, 0.0  ;;  %v827_v33 = vsel %vm823_vm7, %v814_v28, 0.0  ;;  %v829_v36 = vsel %vm823_vm7, %v818_v29, 0.0 }
 0x228   :  { %v826_v32 = vadd.f32 %v825_v31, %v824_v30 }
 0x22a   :  { %v828_v34 = vadd.f32 %v827_v33, %v826_v32 }
 0x22c   :  { %v830_v37 = vadd.f32 %v829_v36, %v828_v34 }
 0x22e   :  { %831 = vadd.xlane.f32.xlu1 %v830_v37 }
 0x2b7   :  { %v832_v38 = vpop.xlane.xlu1 %831 }
 0x2b8   :  { %834 = vst.msk [vmem:[#allocation4] sm:$0x1] %vm833_vm8, %v832_v38 }
 0x2b9   :  { %902 = shalt.err (!%p899_p4)
}
 0x2ba   :  { %844 = dma.vmem_to_hbm [thread:$0]  %s842_s25, 16, %s1132_s9, [#allocation5]  }
 0x2bb   :  { %911 = dma.done.wait [#allocation5], 16  }
 0x2bc   :  { %912 = vsyncadd [#allocation5], 4294967280 }
 0x2bd   :  { %848 = vsyncpa [#allocation5], 1 }

</bundles_post_ra>
